<compile_context>
chip_gen: v5e
topology: v5e:2x2
jax: 0.10.0
libtpu: 0.0.40
codegen_flags: <defaults>
</compile_context>

<pallas_src>
import functools

import jax
import jax.numpy as jnp
from jax.experimental import pallas as pl
from jax.experimental.pallas import tpu as pltpu

LANE = 128


def _round_up(x, m):
    return (x + m - 1) // m * m


def _pick_tiles(n_pad):
    """Node-row tile (TM) and contraction tile (TK), both dividing n_pad."""
    tm = 256 if n_pad % 256 == 0 else 128
    if n_pad % 512 == 0:
        tk = 512
    elif n_pad % 256 == 0:
        tk = 256
    else:
        tk = 128
    return min(tm, n_pad), min(tk, n_pad)


# ----------------------------- Pallas kernels ------------------------------ #

def _xw_kernel(x_ref, w_ref, o_ref):
    """Per-row-tile feature transform: XW_tile = X_tile @ W (bf16 output)."""
    o_ref[...] = jnp.dot(x_ref[...], w_ref[...],
                         preferred_element_type=jnp.float32).astype(o_ref.dtype)


def _aggregate_relu_kernel(adj_ref, xw_ref, b_ref, o_ref, acc_ref):
    """h_tile = relu( sum_k A_hat[i,k] @ XW[k] + b ), K-accumulated in f32."""
    k = pl.program_id(1)

    @pl.when(k == 0)
    def _():
        acc_ref[...] = jnp.zeros_like(acc_ref)

    acc_ref[...] += jnp.dot(adj_ref[...], xw_ref[...],
                            preferred_element_type=jnp.float32)

    @pl.when(k == pl.num_programs(1) - 1)
    def _():
        o_ref[...] = jnp.maximum(acc_ref[...] + b_ref[...], 0.0).astype(o_ref.dtype)


def _aggregate_relu_pool_kernel(adj_ref, xw_ref, b_ref, p_ref, o_ref, acc_ref):
    """Final layer fused with mean pooling: out += P[:, i] @ relu(acc + b)."""
    i = pl.program_id(0)
    k = pl.program_id(1)
    last_k = k == pl.num_programs(1) - 1

    @pl.when(jnp.logical_and(i == 0, k == 0))
    def _():
        o_ref[...] = jnp.zeros_like(o_ref)

    @pl.when(k == 0)
    def _():
        acc_ref[...] = jnp.zeros_like(acc_ref)

    acc_ref[...] += jnp.dot(adj_ref[...], xw_ref[...],
                            preferred_element_type=jnp.float32)

    @pl.when(last_k)
    def _():
        h = jnp.maximum(acc_ref[...] + b_ref[...], 0.0)
        o_ref[...] += jnp.dot(p_ref[...], h, preferred_element_type=jnp.float32)


# --------------------------- pallas_call wrappers --------------------------- #

def feature_transform(h, w_pad, *, tm):
    n_pad, f_in = h.shape
    f_out = w_pad.shape[1]
    return pl.pallas_call(
        _xw_kernel,
        out_shape=jax.ShapeDtypeStruct((n_pad, f_out), jnp.bfloat16),
        grid_spec=pltpu.PrefetchScalarGridSpec(
            num_scalar_prefetch=0,
            grid=(n_pad // tm,),
            in_specs=[pl.BlockSpec((tm, f_in), lambda i: (i, 0)),
                      pl.BlockSpec((f_in, f_out), lambda i: (0, 0))],
            out_specs=pl.BlockSpec((tm, f_out), lambda i: (i, 0)),
        ),
        compiler_params=pltpu.CompilerParams(dimension_semantics=("parallel",)),
    )(h, w_pad)


def gcn_aggregate(adj_bf16, xw_bf16, b_pad, *, tm, tk):
    n_pad = adj_bf16.shape[0]
    d = xw_bf16.shape[1]
    return pl.pallas_call(
        _aggregate_relu_kernel,
        out_shape=jax.ShapeDtypeStruct((n_pad, d), jnp.float32),
        grid_spec=pltpu.PrefetchScalarGridSpec(
            num_scalar_prefetch=0,
            grid=(n_pad // tm, n_pad // tk),
            in_specs=[
                pl.BlockSpec((tm, tk), lambda i, k: (i, k)),   # A_hat tile
                pl.BlockSpec((tk, d), lambda i, k: (k, 0)),    # XW tile
                pl.BlockSpec((1, d), lambda i, k: (0, 0)),     # bias (epilogue only)
            ],
            out_specs=pl.BlockSpec((tm, d), lambda i, k: (i, 0)),
            scratch_shapes=[pltpu.VMEM((tm, d), jnp.float32)],
        ),
        compiler_params=pltpu.CompilerParams(
            dimension_semantics=("parallel", "arbitrary")),
    )(adj_bf16, xw_bf16, b_pad)


def gcn_aggregate_pool(adj_bf16, xw_bf16, b_pad, pool_mat, *, tm, tk):
    n_pad = adj_bf16.shape[0]
    d = xw_bf16.shape[1]
    g_pad = pool_mat.shape[0]
    return pl.pallas_call(
        _aggregate_relu_pool_kernel,
        out_shape=jax.ShapeDtypeStruct((g_pad, d), jnp.float32),
        grid_spec=pltpu.PrefetchScalarGridSpec(
            num_scalar_prefetch=0,
            grid=(n_pad // tm, n_pad // tk),
            in_specs=[
                pl.BlockSpec((tm, tk), lambda i, k: (i, k)),     # A_hat tile
                pl.BlockSpec((tk, d), lambda i, k: (k, 0)),      # XW tile
                pl.BlockSpec((1, d), lambda i, k: (0, 0)),       # bias
                pl.BlockSpec((g_pad, tm), lambda i, k: (0, i)),  # pooling columns
            ],
            out_specs=pl.BlockSpec((g_pad, d), lambda i, k: (0, 0)),  # resident acc
            scratch_shapes=[pltpu.VMEM((tm, d), jnp.float32)],
        ),
        compiler_params=pltpu.CompilerParams(
            dimension_semantics=("arbitrary", "arbitrary")),
    )(adj_bf16, xw_bf16, b_pad, pool_mat)


# ------------------------------ Glue (plain JAX) ---------------------------- #

def build_normalized_adjacency(edge_index, num_nodes, num_nodes_pad):
    """Padded bf16 A_hat = D^{-1/2} (A + I) D^{-1/2} from (2, E) edge_index."""
    src, dst = edge_index
    a = jnp.zeros((num_nodes, num_nodes), jnp.float32)
    a = a.at[dst, src].add(1.0)                     # message flow src -> dst
    a = a + jnp.eye(num_nodes, dtype=jnp.float32)   # self loops
    deg = jnp.sum(a, axis=1)
    d_inv_sqrt = jnp.where(deg > 0, 1.0 / jnp.sqrt(deg), 0.0)
    a_hat = d_inv_sqrt[:, None] * a * d_inv_sqrt[None, :]
    pad = num_nodes_pad - num_nodes
    a_hat = jnp.pad(a_hat, ((0, pad), (0, pad)))    # zero rows/cols for pad nodes
    return a_hat.astype(jnp.bfloat16)


def build_pool_matrix(batch, num_graphs, num_graphs_pad, num_nodes_pad):
    """P[g, n] = 1/count_g if batch[n] == g else 0, zero-padded."""
    num_nodes = batch.shape[0]
    batch_pad = jnp.full((num_nodes_pad,), -1, jnp.int32).at[:num_nodes].set(batch)
    onehot = (batch_pad[None, :] ==
              jnp.arange(num_graphs_pad, dtype=jnp.int32)[:, None]).astype(jnp.float32)
    counts = jnp.maximum(jnp.sum(onehot, axis=1, keepdims=True), 1.0)
    return onehot / counts


def init_params(key, node_feat_dim, hidden_dim, style_dim, num_layers=2):
    dims = [node_feat_dim] + [hidden_dim] * (num_layers - 1) + [style_dim]
    params = []
    for i in range(num_layers):
        key, wk = jax.random.split(key)
        fan_in, fan_out = dims[i], dims[i + 1]
        scale = 1.0 / jnp.sqrt(jnp.float32(fan_in))
        w = jax.random.uniform(wk, (fan_in, fan_out), jnp.float32, -scale, scale)
        b = jnp.zeros((1, fan_out), jnp.float32)
        params.append((w, b))
    return params


@functools.partial(jax.jit, static_argnames=("num_graphs",))
def graph_embedding_forward(x, edge_index, batch, params, num_graphs):
    n, f_in0 = x.shape
    n_pad = max(_round_up(n, LANE), LANE)
    g_pad = _round_up(num_graphs, 8)
    tm, tk = _pick_tiles(n_pad)

    adj = build_normalized_adjacency(edge_index, n, n_pad)          # bf16 (n_pad, n_pad)
    pool_mat = build_pool_matrix(batch, num_graphs, g_pad, n_pad)   # f32 (g_pad, n_pad)

    h = jnp.pad(x, ((0, n_pad - n), (0, _round_up(f_in0, LANE) - f_in0)))

    num_layers = len(params)
    out = None
    for li, (w, b) in enumerate(params):
        f_in, f_out = w.shape
        f_in_pad = _round_up(f_in, LANE)
        f_out_pad = _round_up(f_out, LANE)
        w_pad = jnp.pad(w, ((0, f_in_pad - f_in), (0, f_out_pad - f_out)))
        b_pad = jnp.pad(b, ((0, 0), (0, f_out_pad - f_out)))

        xw = feature_transform(h, w_pad, tm=tm)                     # bf16 (n_pad, f_out_pad)
        if li < num_layers - 1:
            h = gcn_aggregate(adj, xw, b_pad, tm=tm, tk=tk)         # relu + identity dropout
        else:
            out = gcn_aggregate_pool(adj, xw, b_pad, pool_mat, tm=tm, tk=tk)

    style_dim = params[-1][0].shape[1]
    return out[:num_graphs, :style_dim]


def reference_forward(x, edge_index, batch, params, num_graphs):
    """Pure-JAX f32 reference (unpadded) for a correctness check."""
    n = x.shape[0]
    src, dst = edge_index
    a = jnp.zeros((n, n), jnp.float32).at[dst, src].add(1.0) + jnp.eye(n)
    deg = jnp.sum(a, axis=1)
    dis = jnp.where(deg > 0, 1.0 / jnp.sqrt(deg), 0.0)
    a_hat = dis[:, None] * a * dis[None, :]
    h = x
    for w, b in params:
        h = jax.nn.relu(a_hat @ (h @ w) + b)
    onehot = (batch[None, :] == jnp.arange(num_graphs)[:, None]).astype(jnp.float32)
    counts = jnp.maximum(jnp.sum(onehot, axis=1, keepdims=True), 1.0)
    return (onehot / counts) @ h


# ---------------------------------- main ------------------------------------ #

if __name__ == "__main__":
    node_feat_dim, hidden_dim, style_dim, num_layers = 16, 32, 8, 2
    num_nodes, num_graphs = 16, 2

    key = jax.random.PRNGKey(0)
    kx, kp = jax.random.split(key)

    x = jax.random.normal(kx, (num_nodes, node_feat_dim), jnp.float32)

    # Two small undirected graphs: nodes 0..7 (ring), nodes 8..15 (ring).
    edges = []
    for g in range(num_graphs):
        base = g * 8
        for i in range(8):
            a, b = base + i, base + (i + 1) % 8
            edges.append((a, b))
            edges.append((b, a))
    edge_index = jnp.array(edges, jnp.int32).T          # (2, E)
    batch = jnp.repeat(jnp.arange(num_graphs, dtype=jnp.int32), 8)

    params = init_params(kp, node_feat_dim, hidden_dim, style_dim, num_layers)

    out = graph_embedding_forward(x, edge_index, batch, params, num_graphs)
    out = jax.block_until_ready(out)
    assert out.shape == (num_graphs, style_dim)

    ref = reference_forward(x, edge_index, batch, params, num_graphs)
    assert jnp.allclose(out, ref, atol=5e-2, rtol=5e-2), "mismatch vs f32 reference"

    print("KERNEL_OK")
</pallas_src>

<mosaic_0001>
module attributes {stable_mosaic.version = 11 : i64} {
  func.func @_aggregate_relu_kernel(%arg0: i32, %arg1: i32, %arg2: memref<128x128xbf16, #tpu.memory_space<vmem>>, %arg3: memref<128x128xbf16, #tpu.memory_space<vmem>>, %arg4: memref<1x128xf32, #tpu.memory_space<vmem>>, %arg5: memref<128x128xf32, #tpu.memory_space<vmem>>, %arg6: memref<128x128xf32, #tpu.memory_space<vmem>>) attributes {dimension_semantics = [#tpu.dimension_semantics<parallel>, #tpu.dimension_semantics<arbitrary>], iteration_bounds = array<i64: 1, 1>, scalar_prefetch = 0 : i64, scratch_operands = 1 : i64, tpu.core_type = #tpu.core_type<tc>, window_params = [{transform_indices = @transform_0, window_bounds = array<i64: 128, 128>}, {transform_indices = @transform_1, window_bounds = array<i64: 128, 128>}, {pipeline_mode = #tpu.pipeline_mode<synchronous>, transform_indices = @transform_2, window_bounds = array<i64: 1, 128>}, {transform_indices = @transform_3, window_bounds = array<i64: 128, 128>}]} {
    %c0_i32 = arith.constant 0 : i32
    %0 = arith.cmpi eq, %arg1, %c0_i32 : i32
    %1 = arith.extui %0 : i1 to i32
    %c0_i32_0 = arith.constant 0 : i32
    %2 = arith.cmpi ne, %1, %c0_i32_0 : i32
    scf.if %2 {
      %cst_10 = arith.constant 0.000000e+00 : f32
      %12 = vector.broadcast %cst_10 : f32 to vector<128x128xf32>
      %c0_11 = arith.constant 0 : index
      %c0_12 = arith.constant 0 : index
      %13 = vector.load %arg6[%c0_11, %c0_12] : memref<128x128xf32, #tpu.memory_space<vmem>>, vector<128x128xf32>
      tpu.vector_store %arg6[%c0_11, %c0_12], %12 {strides = array<i32>} : memref<128x128xf32, #tpu.memory_space<vmem>>, vector<128x128xf32>,
    } else {
    }
    %c0 = arith.constant 0 : index
    %c0_1 = arith.constant 0 : index
    %3 = vector.load %arg6[%c0, %c0_1] : memref<128x128xf32, #tpu.memory_space<vmem>>, vector<128x128xf32>
    %c0_2 = arith.constant 0 : index
    %c0_3 = arith.constant 0 : index
    %4 = vector.load %arg2[%c0_2, %c0_3] : memref<128x128xbf16, #tpu.memory_space<vmem>>, vector<128x128xbf16>
    %c0_4 = arith.constant 0 : index
    %c0_5 = arith.constant 0 : index
    %5 = vector.load %arg3[%c0_4, %c0_5] : memref<128x128xbf16, #tpu.memory_space<vmem>>, vector<128x128xbf16>
    %cst = arith.constant dense<0.000000e+00> : vector<128x128xf32>
    %6 = tpu.matmul %4, %5, %cst {dimension_numbers = #tpu.dot_dimension_numbers<[1], [0], [0], [1], [0, 0, 1, 1], [], []>} : vector<128x128xbf16>, vector<128x128xbf16>, vector<128x128xf32> -> vector<128x128xf32>
    %7 = arith.addf %3, %6 : vector<128x128xf32>
    %c0_6 = arith.constant 0 : index
    %c0_7 = arith.constant 0 : index
    %8 = vector.load %arg6[%c0_6, %c0_7] : memref<128x128xf32, #tpu.memory_space<vmem>>, vector<128x128xf32>
    tpu.vector_store %arg6[%c0_6, %c0_7], %7 {strides = array<i32>} : memref<128x128xf32, #tpu.memory_space<vmem>>, vector<128x128xf32>,
    %c0_i32_8 = arith.constant 0 : i32
    %9 = arith.cmpi eq, %arg1, %c0_i32_8 : i32
    %10 = arith.extui %9 : i1 to i32
    %c0_i32_9 = arith.constant 0 : i32
    %11 = arith.cmpi ne, %10, %c0_i32_9 : i32
    scf.if %11 {
      %c0_10 = arith.constant 0 : index
      %c0_11 = arith.constant 0 : index
      %12 = vector.load %arg6[%c0_10, %c0_11] : memref<128x128xf32, #tpu.memory_space<vmem>>, vector<128x128xf32>
      %c0_12 = arith.constant 0 : index
      %c0_13 = arith.constant 0 : index
      %13 = vector.load %arg4[%c0_12, %c0_13] : memref<1x128xf32, #tpu.memory_space<vmem>>, vector<1x128xf32>
      %14 = vector.broadcast %13 : vector<1x128xf32> to vector<128x128xf32>
      %15 = arith.addf %12, %14 : vector<128x128xf32>
      %cst_14 = arith.constant 0.000000e+00 : f32
      %16 = vector.broadcast %cst_14 : f32 to vector<128x128xf32>
      %17 = arith.maximumf %15, %16 : vector<128x128xf32>
      %c0_15 = arith.constant 0 : index
      %c0_16 = arith.constant 0 : index
      %18 = vector.load %arg5[%c0_15, %c0_16] : memref<128x128xf32, #tpu.memory_space<vmem>>, vector<128x128xf32>
      tpu.vector_store %arg5[%c0_15, %c0_16], %17 {strides = array<i32>} : memref<128x128xf32, #tpu.memory_space<vmem>>, vector<128x128xf32>,
    } else {
    }
    return
  }
  func.func @transform_0(%arg0: i32, %arg1: i32) -> (i32, i32) {
    %c0_i32 = arith.constant 0 : i32
    return %arg0, %arg1 : i32, i32
  }
  func.func @transform_1(%arg0: i32, %arg1: i32) -> (i32, i32) {
    %c0_i32 = arith.constant 0 : i32
    %c0_i32_0 = arith.constant 0 : i32
    return %arg1, %c0_i32 : i32, i32
  }
  func.func @transform_2(%arg0: i32, %arg1: i32) -> (i32, i32) {
    %c0_i32 = arith.constant 0 : i32
    %c0_i32_0 = arith.constant 0 : i32
    %c0_i32_1 = arith.constant 0 : i32
    return %c0_i32, %c0_i32_0 : i32, i32
  }
  func.func @transform_3(%arg0: i32, %arg1: i32) -> (i32, i32) {
    %c0_i32 = arith.constant 0 : i32
    %c0_i32_0 = arith.constant 0 : i32
    return %arg0, %c0_i32 : i32, i32
  }
}

module attributes {stable_mosaic.version = 11 : i64} {
  func.func @_xw_kernel(%arg0: i32, %arg1: memref<128x128xf32, #tpu.memory_space<vmem>>, %arg2: memref<128x128xf32, #tpu.memory_space<vmem>>, %arg3: memref<128x128xbf16, #tpu.memory_space<vmem>>) attributes {dimension_semantics = [#tpu.dimension_semantics<parallel>], iteration_bounds = array<i64: 1>, scalar_prefetch = 0 : i64, scratch_operands = 0 : i64, tpu.core_type = #tpu.core_type<tc>, window_params = [{transform_indices = @transform_0, window_bounds = array<i64: 128, 128>}, {pipeline_mode = #tpu.pipeline_mode<synchronous>, transform_indices = @transform_1, window_bounds = array<i64: 128, 128>}, {transform_indices = @transform_2, window_bounds = array<i64: 128, 128>}]} {
    %c0 = arith.constant 0 : index
    %c0_0 = arith.constant 0 : index
    %0 = vector.load %arg1[%c0, %c0_0] : memref<128x128xf32, #tpu.memory_space<vmem>>, vector<128x128xf32>
    %c0_1 = arith.constant 0 : index
    %c0_2 = arith.constant 0 : index
    %1 = vector.load %arg2[%c0_1, %c0_2] : memref<128x128xf32, #tpu.memory_space<vmem>>, vector<128x128xf32>
    %cst = arith.constant dense<0.000000e+00> : vector<128x128xf32>
    %2 = tpu.matmul %0, %1, %cst {dimension_numbers = #tpu.dot_dimension_numbers<[1], [0], [0], [1], [0, 0, 1, 1], [], []>} : vector<128x128xf32>, vector<128x128xf32>, vector<128x128xf32> -> vector<128x128xf32>
    %3 = arith.truncf %2 : vector<128x128xf32> to vector<128x128xbf16>
    %c0_3 = arith.constant 0 : index
    %c0_4 = arith.constant 0 : index
    %4 = vector.load %arg3[%c0_3, %c0_4] : memref<128x128xbf16, #tpu.memory_space<vmem>>, vector<128x128xbf16>
    tpu.vector_store %arg3[%c0_3, %c0_4], %3 {strides = array<i32>} : memref<128x128xbf16, #tpu.memory_space<vmem>>, vector<128x128xbf16>,
    return
  }
  func.func @transform_0(%arg0: i32) -> (i32, i32) {
    %c0_i32 = arith.constant 0 : i32
    %c0_i32_0 = arith.constant 0 : i32
    return %arg0, %c0_i32 : i32, i32
  }
  func.func @transform_1(%arg0: i32) -> (i32, i32) {
    %c0_i32 = arith.constant 0 : i32
    %c0_i32_0 = arith.constant 0 : i32
    %c0_i32_1 = arith.constant 0 : i32
    return %c0_i32, %c0_i32_0 : i32, i32
  }
  func.func @transform_2(%arg0: i32) -> (i32, i32) {
    %c0_i32 = arith.constant 0 : i32
    %c0_i32_0 = arith.constant 0 : i32
    return %arg0, %c0_i32 : i32, i32
  }
}

module attributes {stable_mosaic.version = 11 : i64} {
  func.func @_aggregate_relu_pool_kernel(%arg0: i32, %arg1: i32, %arg2: memref<128x128xbf16, #tpu.memory_space<vmem>>, %arg3: memref<128x128xbf16, #tpu.memory_space<vmem>>, %arg4: memref<1x128xf32, #tpu.memory_space<vmem>>, %arg5: memref<8x128xf32, #tpu.memory_space<vmem>>, %arg6: memref<8x128xf32, #tpu.memory_space<vmem>>, %arg7: memref<128x128xf32, #tpu.memory_space<vmem>>) attributes {dimension_semantics = [#tpu.dimension_semantics<arbitrary>, #tpu.dimension_semantics<arbitrary>], iteration_bounds = array<i64: 1, 1>, scalar_prefetch = 0 : i64, scratch_operands = 1 : i64, tpu.core_type = #tpu.core_type<tc>, window_params = [{transform_indices = @transform_0, window_bounds = array<i64: 128, 128>}, {transform_indices = @transform_1, window_bounds = array<i64: 128, 128>}, {pipeline_mode = #tpu.pipeline_mode<synchronous>, transform_indices = @transform_2, window_bounds = array<i64: 1, 128>}, {transform_indices = @transform_3, window_bounds = array<i64: 8, 128>}, {pipeline_mode = #tpu.pipeline_mode<synchronous>, transform_indices = @transform_4, window_bounds = array<i64: 8, 128>}]} {
    %c0_i32 = arith.constant 0 : i32
    %0 = arith.cmpi eq, %arg1, %c0_i32 : i32
    %c0_i32_0 = arith.constant 0 : i32
    %1 = arith.cmpi eq, %arg0, %c0_i32_0 : i32
    %c0_i32_1 = arith.constant 0 : i32
    %2 = arith.cmpi eq, %arg1, %c0_i32_1 : i32
    %3 = arith.andi %1, %2 : i1
    %4 = arith.extui %3 : i1 to i32
    %c0_i32_2 = arith.constant 0 : i32
    %5 = arith.cmpi ne, %4, %c0_i32_2 : i32
    scf.if %5 {
      %cst_13 = arith.constant 0.000000e+00 : f32
      %17 = vector.broadcast %cst_13 : f32 to vector<8x128xf32>
      %c0_14 = arith.constant 0 : index
      %c0_15 = arith.constant 0 : index
      %18 = vector.load %arg6[%c0_14, %c0_15] : memref<8x128xf32, #tpu.memory_space<vmem>>, vector<8x128xf32>
      tpu.vector_store %arg6[%c0_14, %c0_15], %17 {strides = array<i32>} : memref<8x128xf32, #tpu.memory_space<vmem>>, vector<8x128xf32>,
    } else {
    }
    %c0_i32_3 = arith.constant 0 : i32
    %6 = arith.cmpi eq, %arg1, %c0_i32_3 : i32
    %7 = arith.extui %6 : i1 to i32
    %c0_i32_4 = arith.constant 0 : i32
    %8 = arith.cmpi ne, %7, %c0_i32_4 : i32
    scf.if %8 {
      %cst_13 = arith.constant 0.000000e+00 : f32
      %17 = vector.broadcast %cst_13 : f32 to vector<128x128xf32>
      %c0_14 = arith.constant 0 : index
      %c0_15 = arith.constant 0 : index
      %18 = vector.load %arg7[%c0_14, %c0_15] : memref<128x128xf32, #tpu.memory_space<vmem>>, vector<128x128xf32>
      tpu.vector_store %arg7[%c0_14, %c0_15], %17 {strides = array<i32>} : memref<128x128xf32, #tpu.memory_space<vmem>>, vector<128x128xf32>,
    } else {
    }
    %c0 = arith.constant 0 : index
    %c0_5 = arith.constant 0 : index
    %9 = vector.load %arg7[%c0, %c0_5] : memref<128x128xf32, #tpu.memory_space<vmem>>, vector<128x128xf32>
    %c0_6 = arith.constant 0 : index
    %c0_7 = arith.constant 0 : index
    %10 = vector.load %arg2[%c0_6, %c0_7] : memref<128x128xbf16, #tpu.memory_space<vmem>>, vector<128x128xbf16>
    %c0_8 = arith.constant 0 : index
    %c0_9 = arith.constant 0 : index
    %11 = vector.load %arg3[%c0_8, %c0_9] : memref<128x128xbf16, #tpu.memory_space<vmem>>, vector<128x128xbf16>
    %cst = arith.constant dense<0.000000e+00> : vector<128x128xf32>
    %12 = tpu.matmul %10, %11, %cst {dimension_numbers = #tpu.dot_dimension_numbers<[1], [0], [0], [1], [0, 0, 1, 1], [], []>} : vector<128x128xbf16>, vector<128x128xbf16>, vector<128x128xf32> -> vector<128x128xf32>
    %13 = arith.addf %9, %12 : vector<128x128xf32>
    %c0_10 = arith.constant 0 : index
    %c0_11 = arith.constant 0 : index
    %14 = vector.load %arg7[%c0_10, %c0_11] : memref<128x128xf32, #tpu.memory_space<vmem>>, vector<128x128xf32>
    tpu.vector_store %arg7[%c0_10, %c0_11], %13 {strides = array<i32>} : memref<128x128xf32, #tpu.memory_space<vmem>>, vector<128x128xf32>,
    %15 = arith.extui %0 : i1 to i32
    %c0_i32_12 = arith.constant 0 : i32
    %16 = arith.cmpi ne, %15, %c0_i32_12 : i32
    scf.if %16 {
      %c0_13 = arith.constant 0 : index
      %c0_14 = arith.constant 0 : index
      %17 = vector.load %arg7[%c0_13, %c0_14] : memref<128x128xf32, #tpu.memory_space<vmem>>, vector<128x128xf32>
      %c0_15 = arith.constant 0 : index
      %c0_16 = arith.constant 0 : index
      %18 = vector.load %arg4[%c0_15, %c0_16] : memref<1x128xf32, #tpu.memory_space<vmem>>, vector<1x128xf32>
      %19 = vector.broadcast %18 : vector<1x128xf32> to vector<128x128xf32>
      %20 = arith.addf %17, %19 : vector<128x128xf32>
      %cst_17 = arith.constant 0.000000e+00 : f32
      %21 = vector.broadcast %cst_17 : f32 to vector<128x128xf32>
      %22 = arith.maximumf %20, %21 : vector<128x128xf32>
      %c0_18 = arith.constant 0 : index
      %c0_19 = arith.constant 0 : index
      %23 = vector.load %arg6[%c0_18, %c0_19] : memref<8x128xf32, #tpu.memory_space<vmem>>, vector<8x128xf32>
      %c0_20 = arith.constant 0 : index
      %c0_21 = arith.constant 0 : index
      %24 = vector.load %arg5[%c0_20, %c0_21] : memref<8x128xf32, #tpu.memory_space<vmem>>, vector<8x128xf32>
      %cst_22 = arith.constant dense<0.000000e+00> : vector<8x128xf32>
      %25 = tpu.matmul %24, %22, %cst_22 {dimension_numbers = #tpu.dot_dimension_numbers<[1], [0], [0], [1], [0, 0, 1, 1], [], []>} : vector<8x128xf32>, vector<128x128xf32>, vector<8x128xf32> -> vector<8x128xf32>
      %26 = arith.addf %23, %25 : vector<8x128xf32>
      %c0_23 = arith.constant 0 : index
      %c0_24 = arith.constant 0 : index
      %27 = vector.load %arg6[%c0_23, %c0_24] : memref<8x128xf32, #tpu.memory_space<vmem>>, vector<8x128xf32>
      tpu.vector_store %arg6[%c0_23, %c0_24], %26 {strides = array<i32>} : memref<8x128xf32, #tpu.memory_space<vmem>>, vector<8x128xf32>,
    } else {
    }
    return
  }
  func.func @transform_0(%arg0: i32, %arg1: i32) -> (i32, i32) {
    %c0_i32 = arith.constant 0 : i32
    return %arg0, %arg1 : i32, i32
  }
  func.func @transform_1(%arg0: i32, %arg1: i32) -> (i32, i32) {
    %c0_i32 = arith.constant 0 : i32
    %c0_i32_0 = arith.constant 0 : i32
    return %arg1, %c0_i32 : i32, i32
  }
  func.func @transform_2(%arg0: i32, %arg1: i32) -> (i32, i32) {
    %c0_i32 = arith.constant 0 : i32
    %c0_i32_0 = arith.constant 0 : i32
    %c0_i32_1 = arith.constant 0 : i32
    return %c0_i32, %c0_i32_0 : i32, i32
  }
  func.func @transform_3(%arg0: i32, %arg1: i32) -> (i32, i32) {
    %c0_i32 = arith.constant 0 : i32
    %c0_i32_0 = arith.constant 0 : i32
    return %c0_i32, %arg0 : i32, i32
  }
  func.func @transform_4(%arg0: i32, %arg1: i32) -> (i32, i32) {
    %c0_i32 = arith.constant 0 : i32
    %c0_i32_0 = arith.constant 0 : i32
    %c0_i32_1 = arith.constant 0 : i32
    return %c0_i32, %c0_i32_0 : i32, i32
  }
}

</mosaic_0001>

<bundles_post_ra>
// kernel: graph_embedding_forward.4
= control target key start
LH: loop header
LB: loop body
LE: loop exit
PB: predicated region body
PF: predicated region fallthrough
CT: control target
= control target key end

     0   :  { %s374_s1 = inlined_call_operand.vmem [shape: f32[128,128], index: 1, kind: input, shape index: {}]   ;;  %s375_s0 = inlined_call_operand.vmem [shape: f32[128,128], index: 0, kind: input, shape index: {}]   ;;  %s376_s2 = inlined_call_operand.vmem [shape: bf16[128,128], index: 2, kind: output, shape index: {}]  }
   0x1   :  { %v42_v0 = vld [vmem:[%s374_s1 + $0x78] sm:$0xff]  ;;  %v41_v1 = vld [vmem:[%s374_s1 + $0x70] sm:$0xff]  ;;  %v40_v2 = vld [vmem:[%s374_s1 + $0x68] sm:$0xff] }
   0x2   :  { %43 = vmatpush.msra.mxu0 %v42_v0  ;;  %191 = vmatpush.msra.mxu1 %v42_v0  ;;  %v39_v3 = vld [vmem:[%s374_s1 + $0x60] sm:$0xff]  ;;  %v38_v4 = vld [vmem:[%s374_s1 + $0x58] sm:$0xff]  ;;  %v37_v5 = vld [vmem:[%s374_s1 + $0x50] sm:$0xff] }
   0x3   :  { %192 = vmatpush.msra.mxu2 %v42_v0  ;;  %193 = vmatpush.msra.mxu3 %v42_v0  ;;  %v36_v6 = vld [vmem:[%s374_s1 + $0x48] sm:$0xff]  ;;  %v35_v7 = vld [vmem:[%s374_s1 + $0x40] sm:$0xff]  ;;  %v34_v8 = vld [vmem:[%s374_s1 + $0x38] sm:$0xff] }
   0x4   :  { %44 = vmatpush.msra.mxu0 %v41_v1  ;;  %194 = vmatpush.msra.mxu1 %v41_v1  ;;  %v33_v9 = vld [vmem:[%s374_s1 + $0x30] sm:$0xff]  ;;  %v32_v10 = vld [vmem:[%s374_s1 + $0x28] sm:$0xff]  ;;  %v31_v11 = vld [vmem:[%s374_s1 + $0x20] sm:$0xff] }
   0x5   :  { %195 = vmatpush.msra.mxu2 %v41_v1  ;;  %196 = vmatpush.msra.mxu3 %v41_v1  ;;  %v30_v12 = vld [vmem:[%s374_s1 + $0x18] sm:$0xff]  ;;  %v29_v13 = vld [vmem:[%s374_s1 + $0x10] sm:$0xff]  ;;  %v28_v14 = vld [vmem:[%s374_s1 + $0x8] sm:$0xff] }
   0x6   :  { %45 = vmatpush.msra.mxu0 %v40_v2  ;;  %197 = vmatpush.msra.mxu1 %v40_v2  ;;  %v27_v15 = vld [vmem:[%s374_s1] sm:$0xff]  ;;  %v12_v20 = vld [vmem:[%s375_s0 + $0x8] sm:$0xff]  ;;  %v13_v24 = vld [vmem:[%s375_s0 + $0x10] sm:$0xff] }
   0x7   :  { %198 = vmatpush.msra.mxu2 %v40_v2  ;;  %199 = vmatpush.msra.mxu3 %v40_v2  ;;  %v11_v16 = vld [vmem:[%s375_s0] sm:$0xff]  ;;  %v16_v21 = vld [vmem:[%s375_s0 + $0x28] sm:$0xff]  ;;  %v17_v25 = vld [vmem:[%s375_s0 + $0x30] sm:$0xff] }
   0x8   :  { %46 = vmatpush.msra.mxu0 %v39_v3  ;;  %200 = vmatpush.msra.mxu1 %v39_v3  ;;  %v15_v17 = vld [vmem:[%s375_s0 + $0x20] sm:$0xff]  ;;  %v20_v22 = vld [vmem:[%s375_s0 + $0x48] sm:$0xff]  ;;  %v21_v26 = vld [vmem:[%s375_s0 + $0x50] sm:$0xff] }
   0x9   :  { %201 = vmatpush.msra.mxu2 %v39_v3  ;;  %202 = vmatpush.msra.mxu3 %v39_v3  ;;  %v19_v18 = vld [vmem:[%s375_s0 + $0x40] sm:$0xff]  ;;  %v24_v23 = vld [vmem:[%s375_s0 + $0x68] sm:$0xff]  ;;  %v25_v27 = vld [vmem:[%s375_s0 + $0x70] sm:$0xff] }
   0xa   :  { %47 = vmatpush.msra.mxu0 %v38_v4  ;;  %203 = vmatpush.msra.mxu1 %v38_v4  ;;  %v23_v19 = vld [vmem:[%s375_s0 + $0x60] sm:$0xff]  ;;  %v14_v28 = vld [vmem:[%s375_s0 + $0x18] sm:$0xff] }
   0xb   :  { %204 = vmatpush.msra.mxu2 %v38_v4  ;;  %205 = vmatpush.msra.mxu3 %v38_v4  ;;  %v18_v29 = vld [vmem:[%s375_s0 + $0x38] sm:$0xff] }
   0xc   :  { %48 = vmatpush.msra.mxu0 %v37_v5  ;;  %206 = vmatpush.msra.mxu1 %v37_v5  ;;  %v22_v30 = vld [vmem:[%s375_s0 + $0x58] sm:$0xff] }
   0xd   :  { %207 = vmatpush.msra.mxu2 %v37_v5  ;;  %208 = vmatpush.msra.mxu3 %v37_v5  ;;  %v26_v31 = vld [vmem:[%s375_s0 + $0x78] sm:$0xff] }
   0xe   :  { %49 = vmatpush.msra.mxu0 %v36_v6  ;;  %209 = vmatpush.msra.mxu1 %v36_v6 }
   0xf   :  { %210 = vmatpush.msra.mxu2 %v36_v6  ;;  %211 = vmatpush.msra.mxu3 %v36_v6 }
  0x10   :  { %50 = vmatpush.msra.mxu0 %v35_v7  ;;  %212 = vmatpush.msra.mxu1 %v35_v7 }
  0x11   :  { %213 = vmatpush.msra.mxu2 %v35_v7  ;;  %214 = vmatpush.msra.mxu3 %v35_v7 }
  0x12   :  { %51 = vmatpush.msra.mxu0 %v34_v8  ;;  %215 = vmatpush.msra.mxu1 %v34_v8 }
  0x13   :  { %216 = vmatpush.msra.mxu2 %v34_v8  ;;  %217 = vmatpush.msra.mxu3 %v34_v8 }
  0x14   :  { %52 = vmatpush.msra.mxu0 %v33_v9  ;;  %218 = vmatpush.msra.mxu1 %v33_v9 }
  0x15   :  { %219 = vmatpush.msra.mxu2 %v33_v9  ;;  %220 = vmatpush.msra.mxu3 %v33_v9 }
  0x16   :  { %53 = vmatpush.msra.mxu0 %v32_v10  ;;  %221 = vmatpush.msra.mxu1 %v32_v10 }
  0x17   :  { %222 = vmatpush.msra.mxu2 %v32_v10  ;;  %223 = vmatpush.msra.mxu3 %v32_v10 }
  0x18   :  { %54 = vmatpush.msra.mxu0 %v31_v11  ;;  %224 = vmatpush.msra.mxu1 %v31_v11 }
  0x19   :  { %225 = vmatpush.msra.mxu2 %v31_v11  ;;  %226 = vmatpush.msra.mxu3 %v31_v11 }
  0x1a   :  { %55 = vmatpush.msra.mxu0 %v30_v12  ;;  %227 = vmatpush.msra.mxu1 %v30_v12 }
  0x1b   :  { %228 = vmatpush.msra.mxu2 %v30_v12  ;;  %229 = vmatpush.msra.mxu3 %v30_v12 }
  0x1c   :  { %56 = vmatpush.msra.mxu0 %v29_v13  ;;  %230 = vmatpush.msra.mxu1 %v29_v13 }
  0x1d   :  { %231 = vmatpush.msra.mxu2 %v29_v13  ;;  %232 = vmatpush.msra.mxu3 %v29_v13 }
  0x1e   :  { %57 = vmatpush.msra.mxu0 %v28_v14  ;;  %233 = vmatpush.msra.mxu1 %v28_v14 }
  0x1f   :  { %234 = vmatpush.msra.mxu2 %v28_v14  ;;  %235 = vmatpush.msra.mxu3 %v28_v14 }
  0x20   :  { %58 = vmatpush.msra.mxu0 %v27_v15  ;;  %236 = vmatpush.msra.mxu1 %v27_v15 }
  0x21   :  { %237 = vmatpush.msra.mxu2 %v27_v15  ;;  %238 = vmatpush.msra.mxu3 %v27_v15 }
  0x22   :  { %59 = vmatmul.f32.vlgmr.msra.gmra.mxu0 %v11_v16  ;;  %71 = vmatmul.f32.vlgmr.msra.gmra.mxu1 %v15_v17 }
  0x23   :  { %83 = vmatmul.f32.vlgmr.msra.gmra.mxu2 %v19_v18  ;;  %95 = vmatmul.f32.vlgmr.msra.gmra.mxu3 %v23_v19 }
  0x2a   :  { %62 = vmatmul.f32.gmra.mxu0 %v12_v20  ;;  %74 = vmatmul.f32.gmra.mxu1 %v16_v21 }
  0x2b   :  { %86 = vmatmul.f32.gmra.mxu2 %v20_v22  ;;  %98 = vmatmul.f32.gmra.mxu3 %v24_v23 }
  0x32   :  { %65 = vmatmul.f32.gmra.mxu0 %v13_v24  ;;  %77 = vmatmul.f32.gmra.mxu1 %v17_v25 }
  0x33   :  { %89 = vmatmul.f32.gmra.mxu2 %v21_v26  ;;  %101 = vmatmul.f32.gmra.mxu3 %v25_v27 }
  0x3a   :  { %68 = vmatmul.f32.gmra.mxu0 %v14_v28  ;;  %80 = vmatmul.f32.gmra.mxu1 %v18_v29 }
  0x3b   :  { %92 = vmatmul.f32.gmra.mxu2 %v22_v30  ;;  %104 = vmatmul.f32.gmra.mxu3 %v26_v31 }
  0x9f   :  { %v60_v32 = vpop.f32.mrf.mxu0  ;;  %v72_v33 = vpop.f32.mrf.mxu1 }
  0xa6   :  { %v84_v34 = vpop.f32.mrf.mxu2  ;;  %v96_v35 = vpop.f32.mrf.mxu3 }
  0xa7   :  { %v63_v36 = vpop.f32.mrf.mxu0  ;;  %v75_v37 = vpop.f32.mrf.mxu1 }
  0xa8   :  { %v147_v38 = vpack.c.bf16 %v63_v36, %v60_v32  ;;  %v157_v39 = vpack.c.bf16 %v75_v37, %v72_v33 }
  0xaa   :  { %148 = vst [vmem:[%s376_s2] sm:$0xff] %v147_v38  }
  0xab   :  { %185 = vst [vmem:[%s376_s2 + $0x10] sm:$0xff] %v157_v39  }
  0xae   :  { %v87_v40 = vpop.f32.mrf.mxu2  ;;  %v99_v41 = vpop.f32.mrf.mxu3 }
  0xaf   :  { %v167_v42 = vpack.c.bf16 %v87_v40, %v84_v34  ;;  %v177_v43 = vpack.c.bf16 %v99_v41, %v96_v35  ;;  %v66_v44 = vpop.f32.mrf.mxu0  ;;  %v78_v45 = vpop.f32.mrf.mxu1 }
  0xb1   :  { %187 = vst [vmem:[%s376_s2 + $0x20] sm:$0xff] %v167_v42  }
  0xb2   :  { %189 = vst [vmem:[%s376_s2 + $0x30] sm:$0xff] %v177_v43  }
  0xb6   :  { %v90_v46 = vpop.f32.mrf.mxu2  ;;  %v102_v47 = vpop.f32.mrf.mxu3 }
  0xb7   :  { %v69_v48 = vpop.f32.mrf.mxu0  ;;  %v81_v49 = vpop.f32.mrf.mxu1 }
  0xb8   :  { %v152_v50 = vpack.c.bf16 %v69_v48, %v66_v44  ;;  %v162_v51 = vpack.c.bf16 %v81_v49, %v78_v45 }
  0xba   :  { %184 = vst [vmem:[%s376_s2 + $0x8] sm:$0xff] %v152_v50  }
  0xbb   :  { %186 = vst [vmem:[%s376_s2 + $0x18] sm:$0xff] %v162_v51  }
  0xbe   :  { %v93_v52 = vpop.f32.mrf.mxu2  ;;  %v105_v53 = vpop.f32.mrf.mxu3 }
  0xbf   :  { %v172_v54 = vpack.c.bf16 %v93_v52, %v90_v46  ;;  %v182_v55 = vpack.c.bf16 %v105_v53, %v102_v47 }
  0xc1   :  { %188 = vst [vmem:[%s376_s2 + $0x28] sm:$0xff] %v172_v54  }
  0xc2   :  { %190 = vst [vmem:[%s376_s2 + $0x38] sm:$0xff] %v182_v55  }

// kernel: graph_embedding_forward.5
= control target key start
LH: loop header
LB: loop body
LE: loop exit
PB: predicated region body
PF: predicated region fallthrough
CT: control target
= control target key end

     0   :  { %s558_s1 = inlined_call_operand.vmem [shape: bf16[128,128], index: 1, kind: input, shape index: {}]   ;;  %s559_s2 = inlined_call_operand.vmem [shape: f32[1,128], index: 2, kind: input, shape index: {}]   ;;  %s560_s0 = inlined_call_operand.vmem [shape: bf16[128,128], index: 0, kind: input, shape index: {}]   ;;  %s561_s3 = inlined_call_operand.vmem [shape: f32[128,128], index: 3, kind: output, shape index: {}]  }
   0x1   :  { %v413_v0 = vld [vmem:[%s558_s1 + $0x38] sm:$0xff]  ;;  %v412_v1 = vld [vmem:[%s558_s1 + $0x30] sm:$0xff]  ;;  %v411_v2 = vld [vmem:[%s558_s1 + $0x28] sm:$0xff] }
   0x2   :  { %178 = vmatpush.bf16.msra.mxu0 %v413_v0  ;;  %414 = vmatpush.bf16.msra.mxu1 %v413_v0  ;;  %v410_v3 = vld [vmem:[%s558_s1 + $0x20] sm:$0xff]  ;;  %v409_v4 = vld [vmem:[%s558_s1 + $0x18] sm:$0xff]  ;;  %v408_v5 = vld [vmem:[%s558_s1 + $0x10] sm:$0xff] }
   0x3   :  { %415 = vmatpush.bf16.msra.mxu2 %v413_v0  ;;  %416 = vmatpush.bf16.msra.mxu3 %v413_v0  ;;  %v407_v6 = vld [vmem:[%s558_s1 + $0x8] sm:$0xff]  ;;  %v406_v7 = vld [vmem:[%s558_s1] sm:$0xff]  ;;  %v400_v9 = vld [vmem:[%s560_s0 + $0x10] sm:$0xff] }
   0x4   :  { %v398_v8 = vld [vmem:[%s560_s0] sm:$0xff]  ;;  %v404_v11 = vld [vmem:[%s560_s0 + $0x30] sm:$0xff]  ;;  %v399_v12 = vld [vmem:[%s560_s0 + $0x8] sm:$0xff] }
   0x5   :  { %v402_v10 = vld [vmem:[%s560_s0 + $0x20] sm:$0xff]  ;;  %v401_v13 = vld [vmem:[%s560_s0 + $0x18] sm:$0xff]  ;;  %v403_v14 = vld [vmem:[%s560_s0 + $0x28] sm:$0xff] }
   0x6   :  { %179 = vmatpush.bf16.msra.mxu0 %v412_v1  ;;  %417 = vmatpush.bf16.msra.mxu1 %v412_v1  ;;  %v405_v15 = vld [vmem:[%s560_s0 + $0x38] sm:$0xff]  ;;  %v438_v16 = vld [vmem:[%s559_s2] ss:$0 sm:$0xff] }
   0x7   :  { %418 = vmatpush.bf16.msra.mxu2 %v412_v1  ;;  %419 = vmatpush.bf16.msra.mxu3 %v412_v1 }
   0xa   :  { %180 = vmatpush.bf16.msra.mxu0 %v411_v2  ;;  %420 = vmatpush.bf16.msra.mxu1 %v411_v2 }
   0xb   :  { %421 = vmatpush.bf16.msra.mxu2 %v411_v2  ;;  %422 = vmatpush.bf16.msra.mxu3 %v411_v2 }
   0xe   :  { %181 = vmatpush.bf16.msra.mxu0 %v410_v3  ;;  %423 = vmatpush.bf16.msra.mxu1 %v410_v3 }
   0xf   :  { %424 = vmatpush.bf16.msra.mxu2 %v410_v3  ;;  %425 = vmatpush.bf16.msra.mxu3 %v410_v3 }
  0x12   :  { %182 = vmatpush.bf16.msra.mxu0 %v409_v4  ;;  %426 = vmatpush.bf16.msra.mxu1 %v409_v4 }
  0x13   :  { %427 = vmatpush.bf16.msra.mxu2 %v409_v4  ;;  %428 = vmatpush.bf16.msra.mxu3 %v409_v4 }
  0x16   :  { %183 = vmatpush.bf16.msra.mxu0 %v408_v5  ;;  %429 = vmatpush.bf16.msra.mxu1 %v408_v5 }
  0x17   :  { %430 = vmatpush.bf16.msra.mxu2 %v408_v5  ;;  %431 = vmatpush.bf16.msra.mxu3 %v408_v5 }
  0x1a   :  { %184 = vmatpush.bf16.msra.mxu0 %v407_v6  ;;  %432 = vmatpush.bf16.msra.mxu1 %v407_v6 }
  0x1b   :  { %433 = vmatpush.bf16.msra.mxu2 %v407_v6  ;;  %434 = vmatpush.bf16.msra.mxu3 %v407_v6 }
  0x1e   :  { %185 = vmatpush.bf16.msra.mxu0 %v406_v7  ;;  %435 = vmatpush.bf16.msra.mxu1 %v406_v7 }
  0x1f   :  { %436 = vmatpush.bf16.msra.mxu2 %v406_v7  ;;  %437 = vmatpush.bf16.msra.mxu3 %v406_v7 }
  0x21   :  { %186 = vmatmul.bf16.vlgmr.msra.gmra.mxu0 %v398_v8  ;;  %196 = vmatmul.bf16.vlgmr.msra.gmra.mxu1 %v400_v9 }
  0x22   :  { %206 = vmatmul.bf16.vlgmr.msra.gmra.mxu2 %v402_v10  ;;  %216 = vmatmul.bf16.vlgmr.msra.gmra.mxu3 %v404_v11 }
  0x31   :  { %191 = vmatmul.bf16.gmra.mxu0 %v399_v12  ;;  %201 = vmatmul.bf16.gmra.mxu1 %v401_v13 }
  0x32   :  { %211 = vmatmul.bf16.gmra.mxu2 %v403_v14  ;;  %221 = vmatmul.bf16.gmra.mxu3 %v405_v15 }
  0x9e   :  { %v187_v17 = vpop.f32.mrf.mxu0  ;;  %v197_v18 = vpop.f32.mrf.mxu1 }
  0x9f   :  { %v282_v19 = vadd.f32 %v438_v16, %v187_v17  ;;  %v286_v20 = vadd.f32 %v438_v16, %v197_v18 }
  0xa1   :  { %v298_v21 = vmax.f32 %v282_v19, 0.0  ;;  %v302_v22 = vmax.f32 %v286_v20, 0.0 }
  0xa3   :  { %314 = vst [vmem:[%s561_s3] sm:$0xff] %v298_v21 }
  0xa4   :  { %318 = vst [vmem:[%s561_s3 + $0x20] sm:$0xff] %v302_v22 }
  0xa5   :  { %v207_v23 = vpop.f32.mrf.mxu2  ;;  %v217_v24 = vpop.f32.mrf.mxu3 }
  0xa6   :  { %v290_v25 = vadd.f32 %v438_v16, %v207_v23  ;;  %v294_v26 = vadd.f32 %v438_v16, %v217_v24  ;;  %v189_v27 = vpop.f32.mrf.mxu0  ;;  %v199_v28 = vpop.f32.mrf.mxu1 }
  0xa7   :  { %v283_v29 = vadd.f32 %v438_v16, %v189_v27  ;;  %v287_v30 = vadd.f32 %v438_v16, %v199_v28 }
  0xa8   :  { %v306_v31 = vmax.f32 %v290_v25, 0.0  ;;  %v310_v32 = vmax.f32 %v294_v26, 0.0 }
  0xa9   :  { %v299_v33 = vmax.f32 %v283_v29, 0.0  ;;  %v303_v34 = vmax.f32 %v287_v30, 0.0 }
  0xaa   :  { %322 = vst [vmem:[%s561_s3 + $0x40] sm:$0xff] %v306_v31 }
  0xab   :  { %326 = vst [vmem:[%s561_s3 + $0x60] sm:$0xff] %v310_v32 }
  0xac   :  { %315 = vst [vmem:[%s561_s3 + $0x8] sm:$0xff] %v299_v33 }
  0xad   :  { %319 = vst [vmem:[%s561_s3 + $0x28] sm:$0xff] %v303_v34  ;;  %v209_v35 = vpop.f32.mrf.mxu2  ;;  %v219_v36 = vpop.f32.mrf.mxu3 }
  0xae   :  { %v291_v37 = vadd.f32 %v438_v16, %v209_v35  ;;  %v295_v38 = vadd.f32 %v438_v16, %v219_v36  ;;  %v192_v39 = vpop.f32.mrf.mxu0  ;;  %v202_v40 = vpop.f32.mrf.mxu1 }
  0xaf   :  { %v284_v41 = vadd.f32 %v438_v16, %v192_v39  ;;  %v288_v42 = vadd.f32 %v438_v16, %v202_v40 }
  0xb0   :  { %v307_v43 = vmax.f32 %v291_v37, 0.0  ;;  %v311_v44 = vmax.f32 %v295_v38, 0.0 }
  0xb1   :  { %v300_v45 = vmax.f32 %v284_v41, 0.0  ;;  %v304_v46 = vmax.f32 %v288_v42, 0.0 }
  0xb2   :  { %323 = vst [vmem:[%s561_s3 + $0x48] sm:$0xff] %v307_v43 }
  0xb3   :  { %327 = vst [vmem:[%s561_s3 + $0x68] sm:$0xff] %v311_v44 }
  0xb4   :  { %316 = vst [vmem:[%s561_s3 + $0x10] sm:$0xff] %v300_v45 }
  0xb5   :  { %320 = vst [vmem:[%s561_s3 + $0x30] sm:$0xff] %v304_v46  ;;  %v212_v47 = vpop.f32.mrf.mxu2  ;;  %v222_v48 = vpop.f32.mrf.mxu3 }
  0xb6   :  { %v292_v49 = vadd.f32 %v438_v16, %v212_v47  ;;  %v296_v50 = vadd.f32 %v438_v16, %v222_v48  ;;  %v194_v51 = vpop.f32.mrf.mxu0  ;;  %v204_v52 = vpop.f32.mrf.mxu1 }
  0xb7   :  { %v285_v53 = vadd.f32 %v438_v16, %v194_v51  ;;  %v289_v54 = vadd.f32 %v438_v16, %v204_v52 }
  0xb8   :  { %v308_v55 = vmax.f32 %v292_v49, 0.0  ;;  %v312_v56 = vmax.f32 %v296_v50, 0.0 }
  0xb9   :  { %v301_v57 = vmax.f32 %v285_v53, 0.0  ;;  %v305_v58 = vmax.f32 %v289_v54, 0.0 }
  0xba   :  { %324 = vst [vmem:[%s561_s3 + $0x50] sm:$0xff] %v308_v55 }
  0xbb   :  { %328 = vst [vmem:[%s561_s3 + $0x70] sm:$0xff] %v312_v56 }
  0xbc   :  { %317 = vst [vmem:[%s561_s3 + $0x18] sm:$0xff] %v301_v57 }
  0xbd   :  { %321 = vst [vmem:[%s561_s3 + $0x38] sm:$0xff] %v305_v58  ;;  %v214_v59 = vpop.f32.mrf.mxu2  ;;  %v224_v60 = vpop.f32.mrf.mxu3 }
  0xbe   :  { %v293_v61 = vadd.f32 %v438_v16, %v214_v59  ;;  %v297_v62 = vadd.f32 %v438_v16, %v224_v60 }
  0xc0   :  { %v309_v63 = vmax.f32 %v293_v61, 0.0  ;;  %v313_v0 = vmax.f32 %v297_v62, 0.0 }
  0xc2   :  { %325 = vst [vmem:[%s561_s3 + $0x58] sm:$0xff] %v309_v63 }
  0xc3   :  { %329 = vst [vmem:[%s561_s3 + $0x78] sm:$0xff] %v313_v0 }

// kernel: graph_embedding_forward.7
= control target key start
LH: loop header
LB: loop body
LE: loop exit
PB: predicated region body
PF: predicated region fallthrough
CT: control target
= control target key end

     0   :  { %s539_s1 = inlined_call_operand.vmem [shape: bf16[128,128], index: 1, kind: input, shape index: {}]   ;;  %s540_s2 = inlined_call_operand.vmem [shape: f32[1,128], index: 2, kind: input, shape index: {}]   ;;  %s541_s0 = inlined_call_operand.vmem [shape: bf16[128,128], index: 0, kind: input, shape index: {}]   ;;  %s542_s3 = inlined_call_operand.vmem [shape: f32[8,128], index: 3, kind: input, shape index: {}]   ;;  %s543_s4 = inlined_call_operand.vmem [shape: f32[8,128], index: 4, kind: output, shape index: {}]  }
   0x1   :  { %v430_v0 = vld [vmem:[%s539_s1 + $0x38] sm:$0xff]  ;;  %v429_v1 = vld [vmem:[%s539_s1 + $0x30] sm:$0xff]  ;;  %v428_v2 = vld [vmem:[%s539_s1 + $0x28] sm:$0xff] }
   0x2   :  { %433 = vmatpush.bf16.msra.mxu3 %v430_v0  ;;  %431 = vmatpush.bf16.msra.mxu1 %v430_v0  ;;  %v427_v3 = vld [vmem:[%s539_s1 + $0x20] sm:$0xff]  ;;  %v426_v4 = vld [vmem:[%s539_s1 + $0x18] sm:$0xff]  ;;  %v425_v5 = vld [vmem:[%s539_s1 + $0x10] sm:$0xff] }
   0x3   :  { %432 = vmatpush.bf16.msra.mxu2 %v430_v0  ;;  %187 = vmatpush.bf16.msra.mxu0 %v430_v0  ;;  %v424_v6 = vld [vmem:[%s539_s1 + $0x8] sm:$0xff]  ;;  %v423_v7 = vld [vmem:[%s539_s1] sm:$0xff]  ;;  %v417_v9 = vld [vmem:[%s541_s0 + $0x10] sm:$0xff] }
   0x4   :  { %v420_v8 = vld [vmem:[%s541_s0 + $0x28] sm:$0xff]  ;;  %v419_v10 = vld [vmem:[%s541_s0 + $0x20] sm:$0xff]  ;;  %v421_v12 = vld [vmem:[%s541_s0 + $0x30] sm:$0xff] }
   0x5   :  { %v415_v11 = vld [vmem:[%s541_s0] sm:$0xff]  ;;  %v418_v13 = vld [vmem:[%s541_s0 + $0x18] sm:$0xff]  ;;  %v416_v14 = vld [vmem:[%s541_s0 + $0x8] sm:$0xff] }
   0x6   :  { %436 = vmatpush.bf16.msra.mxu3 %v429_v1  ;;  %434 = vmatpush.bf16.msra.mxu1 %v429_v1  ;;  %v422_v15 = vld [vmem:[%s541_s0 + $0x38] sm:$0xff]  ;;  %v456_v25 = vld [vmem:[%s540_s2] ss:$0 sm:$0xff] }
   0x7   :  { %435 = vmatpush.bf16.msra.mxu2 %v429_v1  ;;  %188 = vmatpush.bf16.msra.mxu0 %v429_v1  ;;  %v324_v1 = vld [vmem:[%s542_s3] sm:$0xff] }
   0xa   :  { %439 = vmatpush.bf16.msra.mxu3 %v428_v2  ;;  %437 = vmatpush.bf16.msra.mxu1 %v428_v2 }
   0xb   :  { %438 = vmatpush.bf16.msra.mxu2 %v428_v2  ;;  %189 = vmatpush.bf16.msra.mxu0 %v428_v2 }
   0xe   :  { %442 = vmatpush.bf16.msra.mxu3 %v427_v3  ;;  %440 = vmatpush.bf16.msra.mxu1 %v427_v3 }
   0xf   :  { %441 = vmatpush.bf16.msra.mxu2 %v427_v3  ;;  %190 = vmatpush.bf16.msra.mxu0 %v427_v3 }
  0x12   :  { %445 = vmatpush.bf16.msra.mxu3 %v426_v4  ;;  %443 = vmatpush.bf16.msra.mxu1 %v426_v4 }
  0x13   :  { %444 = vmatpush.bf16.msra.mxu2 %v426_v4  ;;  %191 = vmatpush.bf16.msra.mxu0 %v426_v4 }
  0x16   :  { %448 = vmatpush.bf16.msra.mxu3 %v425_v5  ;;  %446 = vmatpush.bf16.msra.mxu1 %v425_v5 }
  0x17   :  { %447 = vmatpush.bf16.msra.mxu2 %v425_v5  ;;  %192 = vmatpush.bf16.msra.mxu0 %v425_v5 }
  0x1a   :  { %451 = vmatpush.bf16.msra.mxu3 %v424_v6  ;;  %449 = vmatpush.bf16.msra.mxu1 %v424_v6 }
  0x1b   :  { %450 = vmatpush.bf16.msra.mxu2 %v424_v6  ;;  %193 = vmatpush.bf16.msra.mxu0 %v424_v6 }
  0x1e   :  { %454 = vmatpush.bf16.msra.mxu3 %v423_v7  ;;  %452 = vmatpush.bf16.msra.mxu1 %v423_v7 }
  0x1f   :  { %453 = vmatpush.bf16.msra.mxu2 %v423_v7  ;;  %194 = vmatpush.bf16.msra.mxu0 %v423_v7 }
  0x21   :  { %220 = vmatmul.bf16.vlgmr.msra.gmra.mxu3 %v420_v8  ;;  %205 = vmatmul.bf16.vlgmr.msra.gmra.mxu1 %v417_v9 }
  0x22   :  { %215 = vmatmul.bf16.vlgmr.msra.gmra.mxu2 %v419_v10  ;;  %195 = vmatmul.bf16.vlgmr.msra.gmra.mxu0 %v415_v11 }
  0x31   :  { %225 = vmatmul.bf16.gmra.mxu3 %v421_v12  ;;  %210 = vmatmul.bf16.gmra.mxu1 %v418_v13 }
  0x32   :  { %200 = vmatmul.bf16.gmra.mxu0 %v416_v14 }
  0x41   :  { %230 = vmatmul.bf16.gmra.mxu3 %v422_v15 }
  0x9e   :  { %v206_v19 = vpop.f32.mrf.mxu1 }
  0x9f   :  { %v196_v21 = vpop.f32.mrf.mxu0  ;;  %v295_v53 = vadd.f32 %v456_v25, %v206_v19 }
  0xa0   :  { %v291_v61 = vadd.f32 %v456_v25, %v196_v21 }
  0xa1   :  { %v311_v57 = vmax.f32 %v295_v53, 0.0 }
  0xa2   :  { %v307_v0 = vmax.f32 %v291_v61, 0.0 }
  0xa4   :  { %v221_v16 = vpop.f32.mrf.mxu3 }
  0xa5   :  { %v216_v24 = vpop.f32.mrf.mxu2  ;;  %v301_v38 = vadd.f32 %v456_v25, %v221_v16 }
  0xa6   :  { %v208_v22 = vpop.f32.mrf.mxu1  ;;  %v299_v45 = vadd.f32 %v456_v25, %v216_v24 }
  0xa7   :  { %v198_v26 = vpop.f32.mrf.mxu0  ;;  %v317_v44 = vmax.f32 %v301_v38, 0.0  ;;  %v296_v50 = vadd.f32 %v456_v25, %v208_v22 }
  0xa8   :  { %v315_v48 = vmax.f32 %v299_v45, 0.0  ;;  %v292_v59 = vadd.f32 %v456_v25, %v198_v26 }
  0xa9   :  { %v312_v55 = vmax.f32 %v296_v50, 0.0 }
  0xaa   :  { %v308_v63 = vmax.f32 %v292_v59, 0.0 }
  0xac   :  { %v223_v17 = vpop.f32.mrf.mxu3 }
  0xad   :  { %v302_v35 = vadd.f32 %v456_v25, %v223_v17  ;;  %v218_v37 = vpop.f32.mrf.mxu2 }
  0xae   :  { %v211_v30 = vpop.f32.mrf.mxu1  ;;  %v300_v42 = vadd.f32 %v456_v25, %v218_v37 }
  0xaf   :  { %v201_v40 = vpop.f32.mrf.mxu0  ;;  %v318_v41 = vmax.f32 %v302_v35, 0.0  ;;  %v297_v49 = vadd.f32 %v456_v25, %v211_v30 }
  0xb0   :  { %v316_v46 = vmax.f32 %v300_v42, 0.0  ;;  %v293_v58 = vadd.f32 %v456_v25, %v201_v40 }
  0xb1   :  { %v313_v54 = vmax.f32 %v297_v49, 0.0 }
  0xb2   :  { %v309_v62 = vmax.f32 %v293_v58, 0.0 }
  0xb4   :  { %v226_v18 = vpop.f32.mrf.mxu3 }
  0xb5   :  { %v303_v33 = vadd.f32 %v456_v25, %v226_v18 }
  0xb6   :  { %v213_v43 = vpop.f32.mrf.mxu1 }
  0xb7   :  { %v319_v39 = vmax.f32 %v303_v33, 0.0  ;;  %v298_v47 = vadd.f32 %v456_v25, %v213_v43  ;;  %v203_v52 = vpop.f32.mrf.mxu0 }
  0xb8   :  { %v294_v56 = vadd.f32 %v456_v25, %v203_v52 }
  0xb9   :  { %v314_v51 = vmax.f32 %v298_v47, 0.0 }
  0xba   :  { %v310_v60 = vmax.f32 %v294_v56, 0.0 }
  0xbc   :  { %v228_v20 = vpop.f32.mrf.mxu3 }
  0xbd   :  { %v304_v31 = vadd.f32 %v456_v25, %v228_v20 }
  0xbf   :  { %v320_v36 = vmax.f32 %v304_v31, 0.0 }
  0xc4   :  { %v231_v23 = vpop.f32.mrf.mxu3 }
  0xc5   :  { %v305_v28 = vadd.f32 %v456_v25, %v231_v23 }
  0xc7   :  { %v321_v34 = vmax.f32 %v305_v28, 0.0 }
  0xcc   :  { %v233_v27 = vpop.f32.mrf.mxu3 }
  0xcd   :  { %v306_v29 = vadd.f32 %v456_v25, %v233_v27 }
  0xcf   :  { %v322_v32 = vmax.f32 %v306_v29, 0.0 }
  0xd1   :  { %325 = vmatpush.msrb.mxu1 %v322_v32 }
  0xd3   :  { %326 = vmatpush.msrb.mxu1 %v321_v34 }
  0xd5   :  { %327 = vmatpush.msrb.mxu1 %v320_v36 }
  0xd7   :  { %328 = vmatpush.msrb.mxu1 %v319_v39 }
  0xd9   :  { %329 = vmatpush.msrb.mxu1 %v318_v41 }
  0xdb   :  { %330 = vmatpush.msrb.mxu1 %v317_v44 }
  0xdd   :  { %331 = vmatpush.msrb.mxu1 %v316_v46 }
  0xdf   :  { %332 = vmatpush.msrb.mxu1 %v315_v48 }
  0xe1   :  { %333 = vmatpush.msrb.mxu1 %v314_v51 }
  0xe3   :  { %334 = vmatpush.msrb.mxu1 %v313_v54 }
  0xe5   :  { %335 = vmatpush.msrb.mxu1 %v312_v55 }
  0xe7   :  { %336 = vmatpush.msrb.mxu1 %v311_v57 }
  0xe9   :  { %337 = vmatpush.msrb.mxu1 %v310_v60 }
  0xeb   :  { %338 = vmatpush.msrb.mxu1 %v309_v62 }
  0xed   :  { %339 = vmatpush.msrb.mxu1 %v308_v63 }
  0xef   :  { %340 = vmatpush.msrb.mxu1 %v307_v0 }
  0xf0   :  { %341 = vmatmul.f32.vlgmr.msrb.gmra.mxu1 %v324_v1 }
 0x16d   :  { %v342_v2 = vpop.f32.mrf.mxu1 }
 0x16e   :  { %346 = vst [vmem:[%s543_s4] sm:$0xff] %v342_v2 }

</bundles_post_ra>
